<compile_context>
chip_gen: v5e
topology: v5e:2x2
jax: 0.10.0
libtpu: 0.0.40
codegen_flags: <defaults>
</compile_context>

<pallas_src>
import functools

import jax
import jax.numpy as jnp
import numpy as np
from jax.experimental import pallas as pl
from jax.experimental.pallas import tpu as pltpu


def _round_up(x, m):
    return ((x + m - 1) // m) * m


def _cdiv(a, b):
    return -(-a // b)


def _vmem_budget_bytes():
    """~75% of the per-core VMEM (48 MiB on v7x, 96 MiB on v5e/v6e); safe fallback."""
    try:
        cap = int(getattr(pltpu.get_tpu_info(), "vmem_capacity_bytes"))
    except Exception:
        cap = 64 << 20  # conservative (v7x-sized) fallback
    return (cap * 3) // 4


def causal_conv_transpose1d(x, weight, bias, stride, *, tile_t=None, compute_dtype=None):
    """x: (B, C_in, T_in), weight: (C_in, C_out, K) [PyTorch ConvTranspose1d layout],
    bias: (C_out,) or None.  Returns (B, C_out, T_out), T_out = (T_in-1)*stride + K - stride,
    identical to torch.nn.ConvTranspose1d(x)[:, :, :-stride]."""
    B, C_in, T_in = x.shape
    C_in_w, C_out, K = weight.shape
    assert C_in_w == C_in
    s = int(stride)
    assert s >= 1
    T_out = (T_in - 1) * s + K - s
    assert T_out >= 1, "causal trim leaves no output"
    if bias is None:
        bias = jnp.zeros((C_out,), jnp.float32)

    Km = _cdiv(K, s)                  # polyphase taps per output phase
    assert Km - 1 <= 128, "kernel_size/stride too large for the 128-wide halo"
    Tq = _cdiv(T_out, s)              # low-rate frames needed per phase
    n128 = _cdiv(Tq, 128)             # pad time only to 128-lane chunks

    in_dtype = compute_dtype if compute_dtype is not None else x.dtype
    in_item = jnp.dtype(in_dtype).itemsize
    out_item = jnp.dtype(x.dtype).itemsize
    sub = 16 if in_item == 2 else 8

    Cp = _round_up(C_in, sub)                    # padded contraction channels
    raw_M = s * C_out                            # output rows (phase-major)
    n_m = max(1, _cdiv(raw_M, 1024))             # tile M for very large stride*C_out
    tM = _round_up(_cdiv(raw_M, n_m), 8)
    Mp = n_m * tM

    # ---- choose the time tile: 128-multiple, VMEM-budgeted, minimal padding waste ----
    budget = _vmem_budget_bytes()
    fixed_bytes = (2 * Km * tM * max(Cp, 128) * in_item   # weight tile (lane-padded, dbl-buf)
                   + 2 * tM * 128 * 4                     # bias tile (lane-padded)
                   + 2 * Cp * 128 * in_item)              # halo tile
    per_chunk = 2 * 128 * (Cp * in_item + tM * out_item)  # dbl-buffered in+out per 128 cols
    avail = max(budget - fixed_bytes - (4 << 20), per_chunk)
    chunks_cap = max(1, avail // per_chunk)
    if tile_t is None:
        chunks_target = _cdiv(1 << 20, Cp * 128 * in_item)   # aim for >= ~1 MiB input tile
    else:
        chunks_target = _cdiv(int(tile_t), 128)
    chunks_target = int(min(max(chunks_target, 4), chunks_cap, 32))

    best_d, best_cost = 1, None
    for cand in range(1, min(chunks_target, n128) + 1):
        steps = _cdiv(n128, cand)
        cost = steps * cand + steps        # padded chunks + ~1 chunk-equivalent per step
        if best_cost is None or cost <= best_cost:
            best_d, best_cost = cand, cost
    d = best_d
    # keep >=2 grid tiles so both v7x TensorCores get work (v5e/v6e: harmless)
    if B * n_m * _cdiv(n128, d) < 2 and n128 >= 2:
        d = _cdiv(n128, 2)
    tT = 128 * d
    tiles = _cdiv(n128, d)
    Tq_pad = tiles * tT

    # ---- wrapper-side prep (no Km-fold duplication of x) ----
    T_keep = min(T_in, Tq_pad)
    xp = x[:, :, :T_keep]
    xp = jnp.pad(xp, ((0, 0), (0, Cp - C_in), (0, Tq_pad - T_keep)))
    # 128-column left halo per time tile (zeros for the first tile of each batch)
    if tiles > 1:
        h = xp[:, :, :(tiles - 1) * tT].reshape(B, Cp, tiles - 1, tT)[:, :, :, tT - 128:]
        halo = jnp.concatenate([jnp.zeros((B, Cp, 1, 128), xp.dtype), h], axis=2)
    else:
        halo = jnp.zeros((B, Cp, 1, 128), xp.dtype)
    halo = halo.reshape(B, Cp, tiles * 128)

    # W_all[m, r*C_out + co, ci] = weight[ci, co, r + m*stride]   (0 beyond K / in padding)
    w_k = jnp.pad(weight, ((0, Cp - C_in), (0, 0), (0, Km * s - K)))
    w_all = (w_k.reshape(Cp, C_out, Km, s)
                .transpose(2, 3, 1, 0)
                .reshape(Km, s * C_out, Cp))
    w_all = jnp.pad(w_all, ((0, 0), (0, Mp - s * C_out), (0, 0)))
    b_all = jnp.pad(jnp.tile(bias.astype(jnp.float32), s), (0, Mp - s * C_out)).reshape(Mp, 1)

    if compute_dtype is not None:   # opt-in bf16 MXU inputs; accumulation stays f32
        xp = xp.astype(compute_dtype)
        halo = halo.astype(compute_dtype)
        w_all = w_all.astype(compute_dtype)

    # ---- Pallas kernel: Km lane-shifted taps accumulated on the MXU, f32 accumulation ----
    def ct_kernel(x_ref, h_ref, w_ref, b_ref, o_ref):
        x_val = x_ref[...]                                       # (Cp, tT)
        acc = jnp.dot(w_ref[0], x_val, preferred_element_type=jnp.float32)
        if Km > 1:
            full = jnp.concatenate([h_ref[...], x_val], axis=-1)  # (Cp, 128 + tT)
            for m in range(1, Km):
                tap = full[:, 128 - m:128 - m + tT]                # x[.., q - m]
                acc = acc + jnp.dot(w_ref[m], tap, preferred_element_type=jnp.float32)
        o_ref[...] = (acc + b_ref[...]).astype(o_ref.dtype)

    vmem_limit = int(min(budget, max(fixed_bytes + per_chunk * d + (8 << 20), 32 << 20)))

    out = pl.pallas_call(
        ct_kernel,
        out_shape=jax.ShapeDtypeStruct((B, Mp, Tq_pad), x.dtype),
        grid=(n_m, B, tiles),
        in_specs=[
            pl.BlockSpec((None, Cp, tT), lambda i, b, j: (b, 0, j)),    # x tile
            pl.BlockSpec((None, Cp, 128), lambda i, b, j: (b, 0, j)),   # left halo
            pl.BlockSpec((Km, tM, Cp), lambda i, b, j: (0, i, 0)),      # packed weights
            pl.BlockSpec((tM, 1), lambda i, b, j: (i, 0)),              # bias
        ],
        out_specs=pl.BlockSpec((None, tM, tT), lambda i, b, j: (b, i, j)),
        compiler_params=pltpu.CompilerParams(
            dimension_semantics=("parallel", "parallel", "parallel"),
            vmem_limit_bytes=vmem_limit,
        ),
    )(xp, halo, w_all, b_all)

    # Phase interleave + causal trim: one fused XLA pass.  (Left out of the kernel on
    # purpose — the (stride, C_out, tT) -> (C_out, tT*stride) minor-dim relayout is the
    # only Mosaic-fragile step for tiny stride/C_out.)
    y = out[:, :s * C_out, :].reshape(B, s, C_out, Tq_pad)
    y = y.transpose(0, 2, 3, 1).reshape(B, C_out, Tq_pad * s)[:, :, :T_out]
    return y


def ref_causal_conv_transpose1d(x, weight, bias, stride):
    """Pure-JAX reference reproducing torch.nn.ConvTranspose1d followed by [:, :, :-stride]."""
    B, C_in, T_in = x.shape
    _, C_out, K = weight.shape
    L = (T_in - 1) * stride + K
    y = jnp.zeros((B, C_out, L), jnp.float32)
    for k in range(K):
        contrib = jnp.einsum(
            "bci,co->boi", x, weight[:, :, k], precision=jax.lax.Precision.HIGHEST
        )
        y = y.at[:, :, k:k + (T_in - 1) * stride + 1:stride].add(contrib)
    y = y + bias[None, :, None]
    return y[:, :, :-stride]


if __name__ == "__main__":
    # Small, deterministic problem consistent with the module's forward:
    # x: (B, in_channels, T_in); weight: (in_channels, out_channels, K); bias: (out_channels,)
    B, C_in, C_out, K, stride, T_in = 2, 4, 6, 4, 2, 16

    key = jax.random.PRNGKey(0)
    kx, kw, kb = jax.random.split(key, 3)
    x = jax.random.normal(kx, (B, C_in, T_in), dtype=jnp.float32)
    fan = C_out * K
    bound = 1.0 / np.sqrt(fan)
    weight = jax.random.uniform(kw, (C_in, C_out, K), jnp.float32, -bound, bound)
    bias = jax.random.uniform(kb, (C_out,), jnp.float32, -bound, bound)

    run = jax.jit(functools.partial(causal_conv_transpose1d, stride=stride))
    y = jax.block_until_ready(run(x, weight, bias))

    y_ref = ref_causal_conv_transpose1d(x, weight, bias, stride)
    assert y.shape == (B, C_out, (T_in - 1) * stride + K - stride), y.shape
    np.testing.assert_allclose(np.asarray(y), np.asarray(y_ref), rtol=1e-3, atol=1e-3)

    print("KERNEL_OK")
</pallas_src>

<mosaic_0001>
module attributes {stable_mosaic.version = 11 : i64} {
  func.func @ct_kernel(%arg0: i32, %arg1: i32, %arg2: i32, %arg3: memref<1x8x128xf32, #tpu.memory_space<vmem>>, %arg4: memref<1x8x128xf32, #tpu.memory_space<vmem>>, %arg5: memref<2x16x8xf32, #tpu.memory_space<vmem>>, %arg6: memref<16x1xf32, #tpu.memory_space<vmem>>, %arg7: memref<1x16x128xf32, #tpu.memory_space<vmem>>) attributes {dimension_semantics = [#tpu.dimension_semantics<parallel>, #tpu.dimension_semantics<parallel>, #tpu.dimension_semantics<parallel>], iteration_bounds = array<i64: 1, 2, 1>, scalar_prefetch = 0 : i64, scratch_operands = 0 : i64, tpu.core_type = #tpu.core_type<tc>, window_params = [{transform_indices = @transform_0, window_bounds = array<i64: 1, 8, 128>}, {transform_indices = @transform_1, window_bounds = array<i64: 1, 8, 128>}, {transform_indices = @transform_2, window_bounds = array<i64: 2, 16, 8>}, {transform_indices = @transform_3, window_bounds = array<i64: 16, 1>}, {transform_indices = @transform_4, window_bounds = array<i64: 1, 16, 128>}]} {
    %c0 = arith.constant 0 : index
    %c0_0 = arith.constant 0 : index
    %c0_1 = arith.constant 0 : index
    %0 = vector.load %arg3[%c0, %c0_0, %c0_1] : memref<1x8x128xf32, #tpu.memory_space<vmem>>, vector<1x8x128xf32>
    %1 = vector.shape_cast %0 : vector<1x8x128xf32> to vector<8x128xf32>
    %c0_2 = arith.constant 0 : index
    %c0_3 = arith.constant 0 : index
    %c0_4 = arith.constant 0 : index
    %2 = vector.load %arg5[%c0_2, %c0_3, %c0_4] : memref<2x16x8xf32, #tpu.memory_space<vmem>>, vector<1x16x8xf32>
    %3 = vector.shape_cast %2 : vector<1x16x8xf32> to vector<16x8xf32>
    %cst = arith.constant dense<0.000000e+00> : vector<16x128xf32>
    %4 = tpu.matmul %3, %1, %cst {dimension_numbers = #tpu.dot_dimension_numbers<[1], [0], [0], [1], [0, 0, 1, 1], [], []>} : vector<16x8xf32>, vector<8x128xf32>, vector<16x128xf32> -> vector<16x128xf32>
    %c0_5 = arith.constant 0 : index
    %c0_6 = arith.constant 0 : index
    %c0_7 = arith.constant 0 : index
    %5 = vector.load %arg4[%c0_5, %c0_6, %c0_7] : memref<1x8x128xf32, #tpu.memory_space<vmem>>, vector<1x8x128xf32>
    %6 = vector.shape_cast %5 : vector<1x8x128xf32> to vector<8x128xf32>
    %7 = tpu.concatenate %6, %1 in 1 : vector<8x128xf32>, vector<8x128xf32> -> vector<8x256xf32>
    %8 = vector.extract_strided_slice %7 {offsets = [0, 127], sizes = [8, 128], strides = [1, 1]} : vector<8x256xf32> to vector<8x128xf32>
    %c1 = arith.constant 1 : index
    %c0_8 = arith.constant 0 : index
    %c0_9 = arith.constant 0 : index
    %9 = vector.load %arg5[%c1, %c0_8, %c0_9] : memref<2x16x8xf32, #tpu.memory_space<vmem>>, vector<1x16x8xf32>
    %10 = vector.shape_cast %9 : vector<1x16x8xf32> to vector<16x8xf32>
    %cst_10 = arith.constant dense<0.000000e+00> : vector<16x128xf32>
    %11 = tpu.matmul %10, %8, %cst_10 {dimension_numbers = #tpu.dot_dimension_numbers<[1], [0], [0], [1], [0, 0, 1, 1], [], []>} : vector<16x8xf32>, vector<8x128xf32>, vector<16x128xf32> -> vector<16x128xf32>
    %12 = arith.addf %4, %11 : vector<16x128xf32>
    %c0_11 = arith.constant 0 : index
    %c0_12 = arith.constant 0 : index
    %13 = vector.load %arg6[%c0_11, %c0_12] : memref<16x1xf32, #tpu.memory_space<vmem>>, vector<16x1xf32>
    %14 = vector.broadcast %13 : vector<16x1xf32> to vector<16x128xf32>
    %15 = arith.addf %12, %14 : vector<16x128xf32>
    %c0_13 = arith.constant 0 : index
    %c0_14 = arith.constant 0 : index
    %c0_15 = arith.constant 0 : index
    %16 = vector.load %arg7[%c0_13, %c0_14, %c0_15] : memref<1x16x128xf32, #tpu.memory_space<vmem>>, vector<1x16x128xf32>
    %17 = vector.shape_cast %16 : vector<1x16x128xf32> to vector<16x128xf32>
    %18 = vector.shape_cast %15 : vector<16x128xf32> to vector<1x16x128xf32>
    tpu.vector_store %arg7[%c0_13, %c0_14, %c0_15], %18 {strides = array<i32>} : memref<1x16x128xf32, #tpu.memory_space<vmem>>, vector<1x16x128xf32>,
    return
  }
  func.func @transform_0(%arg0: i32, %arg1: i32, %arg2: i32) -> (i32, i32, i32) {
    %c0_i32 = arith.constant 0 : i32
    %c0_i32_0 = arith.constant 0 : i32
    return %arg1, %c0_i32, %arg2 : i32, i32, i32
  }
  func.func @transform_1(%arg0: i32, %arg1: i32, %arg2: i32) -> (i32, i32, i32) {
    %c0_i32 = arith.constant 0 : i32
    %c0_i32_0 = arith.constant 0 : i32
    return %arg1, %c0_i32, %arg2 : i32, i32, i32
  }
  func.func @transform_2(%arg0: i32, %arg1: i32, %arg2: i32) -> (i32, i32, i32) {
    %c0_i32 = arith.constant 0 : i32
    %c0_i32_0 = arith.constant 0 : i32
    %c0_i32_1 = arith.constant 0 : i32
    return %c0_i32, %arg0, %c0_i32_0 : i32, i32, i32
  }
  func.func @transform_3(%arg0: i32, %arg1: i32, %arg2: i32) -> (i32, i32) {
    %c0_i32 = arith.constant 0 : i32
    %c0_i32_0 = arith.constant 0 : i32
    return %arg0, %c0_i32 : i32, i32
  }
  func.func @transform_4(%arg0: i32, %arg1: i32, %arg2: i32) -> (i32, i32, i32) {
    %c0_i32 = arith.constant 0 : i32
    return %arg1, %arg0, %arg2 : i32, i32, i32
  }
}

</mosaic_0001>

<bundles_post_ra>
// kernel: tile.8
= control target key start
LH: loop header
LB: loop body
LE: loop exit
PB: predicated region body
PF: predicated region fallthrough
CT: control target
= control target key end

     0   :  { %s22_s0 = inlined_call_operand.vmem [shape: f32[6], index: 0, kind: input, shape index: {}]   ;;  %s23_s1 = inlined_call_operand.vmem [shape: f32[2,6], index: 1, kind: output, shape index: {}]  }
   0x1   :  { %v4_v0 = vld [vmem:[%s22_s0] ss:$0 sm:$0xff] }
   0x2   :  { %5 = vst [vmem:[%s23_s1] sm:$0x3] %v4_v0 }

// kernel: tile.9
= control target key start
LH: loop header
LB: loop body
LE: loop exit
PB: predicated region body
PF: predicated region fallthrough
CT: control target
= control target key end

     0   :  { %vm7_vm0 = vcmask 48128   ;;  %vm13_vm1 = vcmask 97328   ;;  %s39_s0 = inlined_call_operand.vmem [shape: f32[2,6], index: 0, kind: input, shape index: {}]   ;;  %s40_s1 = inlined_call_operand.vmem [shape: f32[12], index: 1, kind: output, shape index: {}]  }
   0x1   :  { %v4_v0 = vld [vmem:[%s39_s0] sm:$0x3]  ;;  %s22_s0 = smov 6  }
   0x2   :  { %5 = vst [vmem:[#allocation1] sm:$0x3] %v4_v0 }
   0x9   :  { %v10_v1 = vld [vmem:[#allocation1 + $0x1] sm:$0x1]   ;;  %v6_v2 = vld [vmem:[#allocation1] sm:$0x1]  }
   0xa   :  { %11 = vrot.lane.b32.xlu0 %v10_v1, %s22_s0  ;;  %8 = vst.msk [vmem:[#allocation0] sm:$0x1] %vm7_vm0, %v6_v2  }
  0x7c   :  { %v12_v3 = vpop.permute.xlu0 %11  }
  0x7d   :  { %14 = vst.msk [vmem:[#allocation0] sm:$0x1] %vm13_vm1, %v12_v3  }
  0x84   :  { %v17_v4 = vld [vmem:[#allocation0] sm:$0x1] }
  0x85   :  { %20 = vst [vmem:[%s40_s1] sm:$0x1] %v17_v4 }

// kernel: causal_conv_transpose1d.1
= control target key start
LH: loop header
LB: loop body
LE: loop exit
PB: predicated region body
PF: predicated region fallthrough
CT: control target
= control target key end

     0   :  { %s655_s15 = smov 0   ;;  %s657_s16 = smov 0   ;;  %s717_s0 = inlined_call_operand.vmem [shape: f32[2,8,128], index: 0, kind: input, shape index: {}]   ;;  %s718_s1 = inlined_call_operand.vmem [shape: f32[2,8,128], index: 1, kind: input, shape index: {}]   ;;  %s719_s2 = inlined_call_operand.vmem [shape: f32[2,16,8], index: 2, kind: input, shape index: {}]   ;;  %s720_s3 = inlined_call_operand.vmem [shape: f32[16,1], index: 3, kind: input, shape index: {}]   ;;  %s721_s4 = inlined_call_operand.vmem [shape: f32[2,16,128], index: 4, kind: output, shape index: {}]  }
   0x1   :  { %s659_s17 = smov 0  }
   0x2 LB: > { %s29_s18 = sadd.s32 1, %s622_s16  ;;  %p555_p0 = scmp.ge.s32.totalorder %s626_s17, 1  ;;  %s626_s17 = sphi %s659_s17, %s14_s17   ;;  %s622_s16 = sphi %s657_s16, %s723_s16   ;;  %s618_s15 = sphi %s655_s15, %s722_s15  }
   0x3   : > { %p31_p1 = scmp.ge.s32.totalorder %s29_s18, 2  ;;  %p225_p2 = scmp.lt.s32.totalorder %s626_s17, 3 }
   0x5   : > { %s725_s18 = smov (%p31_p1, %s29_s18), 0  ;;  %p226_p3 = pnand %p555_p0, %p225_p2 }
   0x6   : > { %p277_p4 = scmp.lt.s32.totalorder (!%p226_p3), %s618_s15, 1  ;;  %s628_s26 = smov (!%p226_p3), 1  }
   0x7   : > { %229 = sbr.rel (%p226_p3) target bundleno = 275 (0x113), region = 36 }
   0xc   : > { %s727_s15 = smov (!%p277_p4, %s618_s15), 1  ;;  %vm332_vm0 = vcmask 64512   ;;  %v318_v3 = vld [vmem:[%s719_s2 + $0x8] sm:$0xff]  ;;  %v317_v4 = vld [vmem:[%s719_s2] sm:$0xff]  ;;  %v629_v6 = vmov 0   ;;  %vm329_vm1 = vcmask 7168  }
   0xd   : > { %s556_s19 = sshll.u32 %s727_s15, 3  ;;  %v392_v5 = vld [vmem:[%s720_s3 + $0x8] sm:$0xff]  ;;  %603 = vset.pattern.permute.xlu1 %v629_v6  ;;  %v391_v7 = vld [vmem:[%s720_s3] sm:$0xff]  ;;  %602 = vset.pattern.permute.xlu0 %v629_v6  ;;  %v561_v11 = vld [vmem:[%s719_s2 + $0x18] sm:$0xff]  ;;  %s568_s13 = sshll.u32 %s727_s15, 4 }
   0xe   : > { %s283_s22 = scalar_lea.vmem %s717_s0, %s556_s19  ;;  %s290_s25 = scalar_lea.vmem %s718_s1, %s556_s19  ;;  %400 = vperm.xlu1 %603, %v392_v5   ;;  %v560_v12 = vld [vmem:[%s719_s2 + $0x10] sm:$0xff] }
   0xf   : > { %v316_v0 = vld [vmem:[%s283_s22] sm:$0xff]  ;;  %s314_s20 = scalar_lea.vmem %s721_s4, %s568_s13 }
  0x10   : > { %v319_v1 = vld [vmem:[%s290_s25] sm:$0xff]  ;;  %570 = vmatpush.msra.mxu3 %v316_v0  ;;  %383 = vmatpush.msra.mxu1 %v316_v0 }
  0x11   : > { %v597_v2 = vpack.i.bf16 %v316_v0, %v319_v1  ;;  %565 = vmatmul.msk.f32.vlgmr.msra.gmra.mxu3 %vm332_vm0, %v318_v3  ;;  %564 = vmatmul.msk.f32.vlgmr.msra.gmra.mxu1 %vm332_vm0, %v317_v4 }
  0x13   : > { %598 = vrot.lane.b32.xlu0 %v597_v2, %s628_s26 }
  0x1b   : > { %395 = vperm.xlu0 %602, %v391_v7  }
  0x80   : > { %v401_v21 = vpop.permute.xlu1 %400 }
  0x85   : > { %v599_v8 = vpop.permute.xlu0 %598 }
  0x86   : > { %v601_v9 = vunpack.i.h.bf16 %v599_v8  ;;  %v600_v10 = vunpack.i.l.bf16 %v599_v8 }
  0x88   : > { %v330_v13 = vsel %vm329_vm1, %v600_v10, %v601_v9 }
  0x89   : > { %354 = vmatpush.msra.mxu0 %v330_v13  ;;  %569 = vmatpush.msra.mxu2 %v330_v13 }
  0x8a   : > { %563 = vmatmul.msk.f32.vlgmr.msra.gmra.mxu2 %vm332_vm0, %v561_v11  ;;  %562 = vmatmul.msk.f32.vlgmr.msra.gmra.mxu0 %vm332_vm0, %v560_v12 }
  0x8d   : > { %v396_v16 = vpop.permute.xlu0 %395 }
  0x8e   : > { %v385_v14 = vpop.f32.mrf.mxu1 }
  0x94   : > { %v388_v19 = vpop.f32.mrf.mxu3 }
 0x107   : > { %v356_v15 = vpop.f32.mrf.mxu0 }
 0x108   : > { %v386_v17 = vadd.f32 %v385_v14, %v356_v15 }
 0x10a   : > { %v403_v18 = vadd.f32 %v396_v16, %v386_v17 }
 0x10c   : > { %405 = vst [vmem:[%s314_s20] sm:$0xff] %v403_v18 }
 0x10d   : > { %v359_v20 = vpop.f32.mrf.mxu2 }
 0x10e   : > { %v389_v22 = vadd.f32 %v388_v19, %v359_v20 }
 0x110   : > { %v404_v23 = vadd.f32 %v401_v21, %v389_v22 }
 0x112   : > { %406 = vst [vmem:[%s314_s20 + $0x8] sm:$0xff] %v404_v23 }
 0x113 PF: > { %s14_s17 = sadd.s32 1, %s626_s17   ;;  %s722_s15 = smov %s622_s16 }
 0x114   : > { %p11_p5 = scmp.ge.s32.totalorder %s14_s17, 4   ;;  %s723_s16 = smov %s725_s18 }
 0x116   :  { %13 = sbr.rel (!%p11_p5) target bundleno = 2 (0x2), region = 76 }

</bundles_post_ra>
